<compile_context>
chip_gen: v7x
topology: tpu7x:2x2x1
jax: 0.10.0
libtpu: 0.0.40
codegen_flags: <defaults>
</compile_context>

<pallas_src>
import functools

import jax
import jax.numpy as jnp
from jax.experimental import pallas as pl
from jax.experimental.pallas import tpu as pltpu

_SCAL_LANES = 128                        # packed scalar row: lane 0 = reg, lane 1 = loss
_MAX_UNTILED_WORKSET_BYTES = 12 << 20    # no-grid path working-set budget


def _round_up(x, m):
    return ((x + m - 1) // m) * m


def _choose_tile_s(n, elt_bytes, s):
    """~2 MiB of stored ss per tile (amortizes ~0.35us grid-step overhead), capped so
    double-buffered stored tiles plus in-kernel f32 temporaries fit VMEM."""
    target_stored = 2 << 20
    vmem_budget = 24 << 20
    t = target_stored // max(1, n * elt_bytes)
    t_cap = vmem_budget // max(1, n * (2 * elt_bytes + 12))
    t = min(t, t_cap, 8192, _round_up(s, 128))
    # TODO(synk): for very large N (a full-N tile no longer fits VMEM even at
    # TILE_S=128) add an N grid axis instead of shrinking TILE_S further.
    return max(128, (t // 128) * 128)


def _normalize_samples(start_samples, binary):
    """Keep ss in a narrow storage dtype; upcast happens per tile inside the kernel."""
    ss = jnp.asarray(start_samples)
    if ss.dtype == jnp.bool_:
        return ss.astype(jnp.int8)            # 1 byte/element stream
    if ss.dtype in (jnp.int8, jnp.uint8, jnp.bfloat16, jnp.float32):
        return ss                              # stream as stored (no extra HBM pass)
    # wide / exotic dtypes: narrow once (0/1 samples are exact in bf16)
    return ss.astype(jnp.bfloat16 if binary else jnp.float32)


def _squashed_sigmoid(x):
    p = jax.nn.sigmoid(x)
    return (p - 0.5) * 0.6 + 0.5  # probs in [0.2, 0.8] -> logs are well conditioned


def _pack_scalars(reg, loss):
    lane = jax.lax.broadcasted_iota(jnp.int32, (1, _SCAL_LANES), 1)
    return jnp.where(lane == 0, reg, jnp.where(lane == 1, loss, 0.0)).astype(jnp.float32)


# --------------------------------------------------------------------------- kernels

def _reg_only_kernel(alpha, x_ref, probs_ref, scal_ref):
    p = _squashed_sigmoid(x_ref[...])                                   # (1, N)
    probs_ref[...] = p
    reg = jnp.mean(p * jnp.log(p) + (1.0 - p) * jnp.log(1.0 - p))
    scal_ref[...] = _pack_scalars(reg, alpha * reg)


def _small_kernel(alpha, inv_s, binary, x_ref, ss_ref, val_ref, probs_ref, scal_ref):
    p = _squashed_sigmoid(x_ref[...])                                   # (1, N)
    probs_ref[...] = p
    lp = jnp.log(p)
    l1p = jnp.log(1.0 - p)
    reg = jnp.mean(p * lp + (1.0 - p) * l1p)

    val = val_ref[...]                                                  # (1, S) f32
    ss = ss_ref[...].astype(jnp.float32)                                # (S, N) upcast in VMEM
    if binary:
        # ss in {0,1}: log(ss*p + (1-ss)*(1-p)) == ss*lp + (1-ss)*l1p -> one MXU matvec
        vss = jnp.dot(val, ss, preferred_element_type=jnp.float32)      # (1, N)
        loss_ls = (jnp.sum(vss * (lp - l1p)) + jnp.sum(val) * jnp.sum(l1p)) * inv_s
    else:
        # Exact general form (any start_samples values).
        idx = (1.0 - p) + ss * (2.0 * p - 1.0)                          # ss*p + (1-ss)*(1-p)
        loss_ls = jnp.sum(
            jnp.dot(val, jnp.log(idx), preferred_element_type=jnp.float32)) * inv_s
    scal_ref[...] = _pack_scalars(reg, loss_ls + alpha * reg)


def _partial_kernel(S, tile_s, tiles_total, tiles_per_split, binary,
                    x_ref, ss_ref, val_ref, out_ref, acc_ref):
    """Accumulate one (1, N) partial per S-split:
       binary: acc += value @ ss         (exactness of 0/1 lets logs move to finalize)
       exact : acc += value @ log(idx)"""
    c = pl.program_id(0)                  # S split ("parallel": one per TensorCore)
    i = pl.program_id(1)                  # tile within the split ("arbitrary")

    @pl.when(i == 0)
    def _():
        acc_ref[...] = jnp.zeros_like(acc_ref)

    g = c * tiles_per_split + i                                 # logical tile id
    start = jnp.minimum(g, tiles_total - 1) * tile_s            # element start actually loaded
    own_lo = g * tile_s                                         # rows this tile "owns"

    row = start + jax.lax.broadcasted_iota(jnp.int32, (tile_s, 1), 0)
    lane = start + jax.lax.broadcasted_iota(jnp.int32, (1, tile_s), 1)
    row_ok = (row >= own_lo) & (row < S)
    lane_ok = (lane >= own_lo) & (lane < S)

    # Mask BOTH sides to zero so uninitialized buffer tails (ragged last tile) and
    # the clamped duplicate overflow tile contribute exactly 0 (never 0 * NaN).
    val = jnp.where(lane_ok, val_ref[...], 0.0)                          # (1, tile_s)
    ss = jnp.where(row_ok, ss_ref[...].astype(jnp.float32), 0.0)         # (tile_s, N)

    if binary:
        contrib = jnp.dot(val, ss, preferred_element_type=jnp.float32)   # (1, N)
    else:
        p = _squashed_sigmoid(x_ref[...])                                # (1, N)
        idx = (1.0 - p) + ss * (2.0 * p - 1.0)
        logidx = jnp.where(row_ok, jnp.log(idx), 0.0)
        contrib = jnp.dot(val, logidx, preferred_element_type=jnp.float32)
    acc_ref[...] += contrib

    @pl.when(i == pl.num_programs(1) - 1)
    def _():
        out_ref[...] = jnp.broadcast_to(acc_ref[...], out_ref.shape)     # row 0 meaningful


def _finalize_kernel(alpha, inv_s, binary, x_ref, acc_ref, sval_ref, probs_ref, scal_ref):
    p = _squashed_sigmoid(x_ref[...])                                    # (1, N)
    probs_ref[...] = p
    lp = jnp.log(p)
    l1p = jnp.log(1.0 - p)
    reg = jnp.mean(p * lp + (1.0 - p) * l1p)

    a = acc_ref[...]                                # (splits*8, N); row 8*c holds split c
    splits = a.shape[0] // 8
    tot = a[0:1, :]
    for c in range(1, splits):
        tot = tot + a[8 * c:8 * c + 1, :]

    if binary:
        loss_ls = (jnp.sum(tot * (lp - l1p)) + sval_ref[0, 0] * jnp.sum(l1p)) * inv_s
    else:
        loss_ls = jnp.sum(tot) * inv_s
    scal_ref[...] = _pack_scalars(reg, loss_ls + alpha * reg)


# --------------------------------------------------------------------------- wrapper

def simple_forward(weight, bias, alpha=0.1, start_samples=None, value=None,
                   assume_binary_samples=True,
                   max_untiled_bytes=_MAX_UNTILED_WORKSET_BYTES,
                   tile_s=None):
    """Forward pass of `simple`.

    weight: (N, 1) or (N,) Linear(1, N) weight; bias: (N,).
    start_samples: optional (S, N) samples; value: (S,) sample returns.
    assume_binary_samples: exploit ss in {0,1} (exact for MCPG's Bernoulli draws;
        set False for arbitrary-valued samples -- the exact form is also tiled).
    tile_s: optional override of the adaptive S tile (multiple of 128), mainly for tests.
    """
    w = jnp.asarray(weight, jnp.float32).reshape(-1)
    b = jnp.asarray(bias, jnp.float32).reshape(-1)
    N = w.shape[0]
    x2 = (w + b).reshape(1, N)            # Linear(1, N)(ones(1)) == W[:, 0] + b

    alpha = float(alpha)
    vmem = pl.BlockSpec(memory_space=pltpu.MemorySpace.VMEM)
    probs_shape = jax.ShapeDtypeStruct((1, N), jnp.float32)
    scal_shape = jax.ShapeDtypeStruct((1, _SCAL_LANES), jnp.float32)

    if start_samples is None:
        probs, scal = pl.pallas_call(
            functools.partial(_reg_only_kernel, alpha),
            in_specs=[vmem],
            out_specs=(vmem, vmem),
            out_shape=(probs_shape, scal_shape),
        )(x2)
    else:
        binary = bool(assume_binary_samples)
        ss = _normalize_samples(start_samples, binary)          # narrow storage dtype
        S = ss.shape[0]
        inv_s = 1.0 / float(S)
        elt = ss.dtype.itemsize
        # res_samples = value.t(): for 1-D / (S,1) / (1,S) value it is value itself.
        val_row = jnp.asarray(value, jnp.float32).reshape(1, S)  # lane-dense

        # Working-set estimate of the no-grid path: stored ss + in-kernel f32 upcast
        # (+ idx/log f32 temporaries for the exact form).
        work_bytes = ss.size * (elt + (4 if binary else 12))

        if work_bytes <= max_untiled_bytes:
            probs, scal = pl.pallas_call(
                functools.partial(_small_kernel, alpha, inv_s, binary),
                in_specs=[vmem, vmem, vmem],
                out_specs=(vmem, vmem),
                out_shape=(probs_shape, scal_shape),
                compiler_params=pltpu.CompilerParams(
                    vmem_limit_bytes=min(56 << 20,
                                         max(32 << 20, int(work_bytes) + (8 << 20)))),
            )(x2, ss, val_row)
        else:
            ts = int(tile_s) if tile_s is not None else _choose_tile_s(N, elt, S)
            T = int(pl.cdiv(S, ts))           # total logical tiles over S
            splits = 2 if T >= 2 else 1       # v7x: one S shard per TensorCore
            tps = int(pl.cdiv(T, splits))     # tiles per shard (last shard may see one
                                              # clamped duplicate tile -> fully masked)

            def ss_map(c, i):
                return (jnp.minimum(c * tps + i, T - 1), 0)

            def val_map(c, i):
                return (0, jnp.minimum(c * tps + i, T - 1))

            tile_bytes = ts * N * elt
            vmem_limit = min(56 << 20,
                             max(32 << 20, 2 * tile_bytes + 4 * ts * N * 4 + (8 << 20)))

            acc = pl.pallas_call(
                functools.partial(_partial_kernel, S, ts, T, tps, binary),
                grid=(splits, tps),
                in_specs=[
                    pl.BlockSpec((1, N), lambda c, i: (0, 0)),      # x (exact form only)
                    pl.BlockSpec((ts, N), ss_map),                  # ss tile (stored dtype)
                    pl.BlockSpec((1, ts), val_map),                 # value tile (f32)
                ],
                out_specs=pl.BlockSpec((8, N), lambda c, i: (c, 0)),
                out_shape=jax.ShapeDtypeStruct((splits * 8, N), jnp.float32),
                scratch_shapes=[pltpu.VMEM((1, N), jnp.float32)],
                compiler_params=pltpu.CompilerParams(
                    dimension_semantics=("parallel", "arbitrary"),
                    vmem_limit_bytes=vmem_limit),
            )(x2, ss, val_row)

            sum_val = jnp.sum(val_row, dtype=jnp.float32).reshape(1, 1)
            probs, scal = pl.pallas_call(
                functools.partial(_finalize_kernel, alpha, inv_s, binary),
                in_specs=[vmem, vmem, vmem],
                out_specs=(vmem, vmem),
                out_shape=(probs_shape, scal_shape),
            )(x2, acc, sum_val)

    return {
        "output": [probs.reshape(N), "hist"],     # probs.squeeze(-1)
        "reg": [scal[0, 0], "sequence"],
        "loss": [scal[0, 1], "sequence"],
    }


def _reference(weight, bias, alpha, start_samples=None, value=None):
    """Pure-JAX reference mirroring the PyTorch forward."""
    x = jnp.asarray(weight, jnp.float32).reshape(-1) + jnp.asarray(bias, jnp.float32).reshape(-1)
    p = jax.nn.sigmoid(x)
    p = (p - 0.5) * 0.6 + 0.5
    reg = jnp.mean(p * jnp.log(p) + (1 - p) * jnp.log(1 - p))
    if start_samples is None:
        return p, reg, alpha * reg
    ss = jnp.asarray(start_samples, jnp.float32)
    idx = ss * p + (1 - ss) * (1 - p)
    log_ss = jnp.sum(jnp.log(idx), axis=1)
    loss = jnp.mean(log_ss * jnp.asarray(value, jnp.float32).reshape(-1)) + alpha * reg
    return p, reg, loss


if __name__ == "__main__":
    key = jax.random.PRNGKey(0)
    N = 256   # output_num (number of graph nodes)
    S = 8     # number of MCPG samples

    kw, kb, ks, kv = jax.random.split(key, 4)
    # torch.nn.Linear(1, N) init: uniform weight (N, 1) and bias (N,).
    weight = jax.random.uniform(kw, (N, 1), jnp.float32, -1.0, 1.0)
    bias = jax.random.uniform(kb, (N,), jnp.float32, -1.0, 1.0)
    start_samples = jax.random.bernoulli(ks, 0.5, (S, N)).astype(jnp.float32)
    value = jax.random.normal(kv, (S,), jnp.float32)

    p_ref, reg_ref, loss_ref = _reference(weight, bias, 0.1, start_samples, value)

    # 1) Small-S binary path (single invocation, folded MXU form, f32 ss passthrough).
    out = simple_forward(weight, bias, alpha=0.1, start_samples=start_samples, value=value)
    probs = jax.block_until_ready(out["output"][0])
    reg = jax.block_until_ready(out["reg"][0])
    loss = jax.block_until_ready(out["loss"][0])
    assert jnp.allclose(probs, p_ref, atol=1e-5), "probs mismatch"
    assert jnp.allclose(reg, reg_ref, atol=1e-5), "reg mismatch"
    assert jnp.allclose(loss, loss_ref, atol=1e-4, rtol=1e-4), "loss mismatch"

    # 2) No-samples path (loss = alpha * reg).
    out0 = simple_forward(weight, bias, alpha=0.1)
    loss0 = jax.block_until_ready(out0["loss"][0])
    assert jnp.allclose(loss0, 0.1 * reg_ref, atol=1e-5), "alpha*reg mismatch"

    # 3) Exact (direct-log) small path, no binary assumption.
    out_g = simple_forward(weight, bias, alpha=0.1, start_samples=start_samples,
                           value=value, assume_binary_samples=False)
    loss_g = jax.block_until_ready(out_g["loss"][0])
    assert jnp.allclose(loss_g, loss_ref, atol=1e-4, rtol=1e-4), "direct-form loss mismatch"

    # 4) Tiled large-S path: bool samples streamed as int8, ragged S (1219), forced
    #    small tile so the 2-way split / clamped overflow tile / row masks are exercised.
    S_big = 1219
    ksb, kvb = jax.random.split(jax.random.PRNGKey(1))
    ss_big = jax.random.bernoulli(ksb, 0.5, (S_big, N))          # bool -> int8 stream
    val_big = jax.random.normal(kvb, (S_big,), jnp.float32)
    pb_ref, rb_ref, lb_ref = _reference(weight, bias, 0.1, ss_big, val_big)
    out_t = simple_forward(weight, bias, alpha=0.1, start_samples=ss_big,
                           value=val_big, max_untiled_bytes=0, tile_s=256)
    probs_t = jax.block_until_ready(out_t["output"][0])
    reg_t = jax.block_until_ready(out_t["reg"][0])
    loss_t = jax.block_until_ready(out_t["loss"][0])
    assert jnp.allclose(probs_t, pb_ref, atol=1e-5), "tiled probs mismatch"
    assert jnp.allclose(reg_t, rb_ref, atol=1e-5), "tiled reg mismatch"
    assert jnp.allclose(loss_t, lb_ref, atol=1e-3, rtol=2e-3), "tiled loss mismatch"

    # 5) Tiled exact (non-binary) path on the same data.
    out_te = simple_forward(weight, bias, alpha=0.1, start_samples=ss_big,
                            value=val_big, assume_binary_samples=False,
                            max_untiled_bytes=0, tile_s=256)
    loss_te = jax.block_until_ready(out_te["loss"][0])
    assert jnp.allclose(loss_te, lb_ref, atol=1e-3, rtol=2e-3), "tiled exact loss mismatch"

    print("KERNEL_OK")
</pallas_src>

<mosaic_0001>
module attributes {stable_mosaic.version = 11 : i64} {
  func.func @_small_kernel(%arg0: memref<1x256xf32, #tpu.memory_space<vmem>>, %arg1: memref<8x256xf32, #tpu.memory_space<vmem>>, %arg2: memref<1x8xf32, #tpu.memory_space<vmem>>, %arg3: memref<1x256xf32, #tpu.memory_space<vmem>>, %arg4: memref<1x128xf32, #tpu.memory_space<vmem>>) attributes {dimension_semantics = [], scalar_prefetch = 0 : i64, scratch_operands = 0 : i64, tpu.core_type = #tpu.core_type<tc>} {
    %c0 = arith.constant 0 : index
    %c0_0 = arith.constant 0 : index
    %0 = vector.load %arg0[%c0, %c0_0] : memref<1x256xf32, #tpu.memory_space<vmem>>, vector<1x256xf32>
    %1 = arith.negf %0 : vector<1x256xf32>
    %2 = math.exp %1 : vector<1x256xf32>
    %cst = arith.constant 1.000000e+00 : f32
    %3 = vector.broadcast %cst : f32 to vector<1x256xf32>
    %4 = arith.addf %3, %2 : vector<1x256xf32>
    %5 = arith.divf %3, %4 : vector<1x256xf32>
    %cst_1 = arith.constant 5.000000e-01 : f32
    %6 = vector.broadcast %cst_1 : f32 to vector<1x256xf32>
    %7 = arith.subf %5, %6 : vector<1x256xf32>
    %cst_2 = arith.constant 6.000000e-01 : f32
    %8 = vector.broadcast %cst_2 : f32 to vector<1x256xf32>
    %9 = arith.mulf %7, %8 : vector<1x256xf32>
    %cst_3 = arith.constant 5.000000e-01 : f32
    %10 = vector.broadcast %cst_3 : f32 to vector<1x256xf32>
    %11 = arith.addf %9, %10 : vector<1x256xf32>
    %c0_4 = arith.constant 0 : index
    %c0_5 = arith.constant 0 : index
    %12 = vector.load %arg3[%c0_4, %c0_5] : memref<1x256xf32, #tpu.memory_space<vmem>>, vector<1x256xf32>
    tpu.vector_store %arg3[%c0_4, %c0_5], %11 {strides = array<i32>} : memref<1x256xf32, #tpu.memory_space<vmem>>, vector<1x256xf32>,
    %13 = math.log %11 : vector<1x256xf32>
    %cst_6 = arith.constant 1.000000e+00 : f32
    %14 = vector.broadcast %cst_6 : f32 to vector<1x256xf32>
    %15 = arith.subf %14, %11 : vector<1x256xf32>
    %16 = math.log %15 : vector<1x256xf32>
    %17 = arith.mulf %11, %13 : vector<1x256xf32>
    %cst_7 = arith.constant 1.000000e+00 : f32
    %18 = vector.broadcast %cst_7 : f32 to vector<1x256xf32>
    %19 = arith.subf %18, %11 : vector<1x256xf32>
    %20 = arith.mulf %19, %16 : vector<1x256xf32>
    %21 = arith.addf %17, %20 : vector<1x256xf32>
    %22 = vector.shape_cast %21 : vector<1x256xf32> to vector<1x1x256xf32>
    %cst_8 = arith.constant dense<0.000000e+00> : vector<1xf32>
    %23 = vector.multi_reduction <add>, %22, %cst_8 [1, 2] : vector<1x1x256xf32> to vector<1xf32>
    %24 = vector.shape_cast %23 : vector<1xf32> to vector<1x1x1xf32>
    %25 = vector.extract %24[0, 0, 0] : f32 from vector<1x1x1xf32>
    %cst_9 = arith.constant 2.560000e+02 : f32
    %26 = arith.divf %25, %cst_9 : f32
    %c0_10 = arith.constant 0 : index
    %c0_11 = arith.constant 0 : index
    %27 = vector.load %arg2[%c0_10, %c0_11] : memref<1x8xf32, #tpu.memory_space<vmem>>, vector<1x8xf32>
    %c0_12 = arith.constant 0 : index
    %c0_13 = arith.constant 0 : index
    %28 = vector.load %arg1[%c0_12, %c0_13] : memref<8x256xf32, #tpu.memory_space<vmem>>, vector<8x256xf32>
    %cst_14 = arith.constant dense<0.000000e+00> : vector<1x256xf32>
    %29 = tpu.matmul %27, %28, %cst_14 {dimension_numbers = #tpu.dot_dimension_numbers<[1], [0], [0], [1], [0, 0, 1, 1], [], []>} : vector<1x8xf32>, vector<8x256xf32>, vector<1x256xf32> -> vector<1x256xf32>
    %30 = arith.subf %13, %16 : vector<1x256xf32>
    %31 = arith.mulf %29, %30 : vector<1x256xf32>
    %32 = vector.shape_cast %31 : vector<1x256xf32> to vector<1x1x256xf32>
    %cst_15 = arith.constant dense<0.000000e+00> : vector<1xf32>
    %33 = vector.multi_reduction <add>, %32, %cst_15 [1, 2] : vector<1x1x256xf32> to vector<1xf32>
    %34 = vector.shape_cast %33 : vector<1xf32> to vector<1x1x1xf32>
    %35 = vector.extract %34[0, 0, 0] : f32 from vector<1x1x1xf32>
    %36 = vector.shape_cast %27 : vector<1x8xf32> to vector<1x1x8xf32>
    %cst_16 = arith.constant dense<0.000000e+00> : vector<1xf32>
    %37 = vector.multi_reduction <add>, %36, %cst_16 [1, 2] : vector<1x1x8xf32> to vector<1xf32>
    %38 = vector.shape_cast %37 : vector<1xf32> to vector<1x1x1xf32>
    %39 = vector.extract %38[0, 0, 0] : f32 from vector<1x1x1xf32>
    %40 = vector.shape_cast %16 : vector<1x256xf32> to vector<1x1x256xf32>
    %cst_17 = arith.constant dense<0.000000e+00> : vector<1xf32>
    %41 = vector.multi_reduction <add>, %40, %cst_17 [1, 2] : vector<1x1x256xf32> to vector<1xf32>
    %42 = vector.shape_cast %41 : vector<1xf32> to vector<1x1x1xf32>
    %43 = vector.extract %42[0, 0, 0] : f32 from vector<1x1x1xf32>
    %44 = arith.mulf %39, %43 : f32
    %45 = arith.addf %35, %44 : f32
    %cst_18 = arith.constant 1.250000e-01 : f32
    %46 = arith.mulf %45, %cst_18 : f32
    %cst_19 = arith.constant 1.000000e-01 : f32
    %47 = arith.mulf %cst_19, %26 : f32
    %48 = arith.addf %46, %47 : f32
    %49 = tpu.iota {dimensions = array<i32: 1>} : vector<1x128xi32>
    %c0_i32 = arith.constant 0 : i32
    %50 = vector.broadcast %c0_i32 : i32 to vector<1x128xi32>
    %51 = arith.cmpi eq, %49, %50 : vector<1x128xi32>
    %c1_i32 = arith.constant 1 : i32
    %52 = vector.broadcast %c1_i32 : i32 to vector<1x128xi32>
    %53 = arith.cmpi eq, %49, %52 : vector<1x128xi32>
    %cst_20 = arith.constant 0.000000e+00 : f32
    %54 = vector.broadcast %48 : f32 to vector<1x128xf32>
    %55 = vector.broadcast %cst_20 : f32 to vector<1x128xf32>
    %56 = arith.select %53, %54, %55 : vector<1x128xi1>, vector<1x128xf32>
    %57 = vector.broadcast %26 : f32 to vector<1x128xf32>
    %58 = arith.select %51, %57, %56 : vector<1x128xi1>, vector<1x128xf32>
    %c0_21 = arith.constant 0 : index
    %c0_22 = arith.constant 0 : index
    %59 = vector.load %arg4[%c0_21, %c0_22] : memref<1x128xf32, #tpu.memory_space<vmem>>, vector<1x128xf32>
    tpu.vector_store %arg4[%c0_21, %c0_22], %58 {strides = array<i32>} : memref<1x128xf32, #tpu.memory_space<vmem>>, vector<1x128xf32>,
    return
  }
}

</mosaic_0001>

<bundles_post_ra>
// kernel: tpu_custom_call.1
= control target key start
LH: loop header
LB: loop body
LE: loop exit
PB: predicated region body
PF: predicated region fallthrough
CT: control target
= control target key end

     0   :  { %10 = vsyncpa [#allocation3], 0  ;;  %s484_s0 = inlined_call_operand.hbm [shape: f32[1,256], index: 0, kind: input, shape index: {}]   ;;  %s485_s1 = inlined_call_operand.hbm [shape: f32[8,256], index: 1, kind: input, shape index: {}]   ;;  %s486_s2 = inlined_call_operand.vmem [shape: f32[1,8], index: 2, kind: input, shape index: {}]   ;;  %s487_s3 = inlined_call_operand.hbm [shape: f32[1,256], index: 3, kind: output, shape index: {0}]   ;;  %s488_s4 = inlined_call_operand.hbm [shape: f32[1,128], index: 4, kind: output, shape index: {1}]  }
   0x1   :  { %11 = vsyncpa [#allocation6], 0 }
   0x2   :  { %12 = vsyncpa [#allocation4], 0 }
   0x3   :  { %13 = vsyncpa [#allocation9], 0  ;;  %s394_s15 = smov [#allocation2]   ;;  %s395_s17 = smov [#allocation5]  }
   0x4   :  { %s20_s16 = sshll.u32 %s394_s15, 4  ;;  %s30_s18 = sshll.u32 %s395_s17, 4  ;;  %s21_s16 = int_to_ptr.vmem [resolvable:$true] %s20_s16  ;;  %s31_s18 = int_to_ptr.vmem [resolvable:$true] %s30_s18 }
   0x5   :  { %s298_s21 = scalar_lea.hbm %s484_s0, 32 }
   0x6   :  { %p299_p0 = scmp.ne.s32.totalorder %s484_s0, %s298_s21  ;;  %p302_p1 = scmp.lt.u32.totalorder %s298_s21, %s484_s0 }
   0x8   :  { %p304_p2 = pnand %p302_p1, %p299_p0 }
   0xa   :  { %307 = shalt.err (!%p304_p2)
}
   0xb   :  { %s308_s26 = scalar_lea.vmem %s21_s16, 32  ;;  %p313_p4 = scmp.lt.s32.totalorder %s21_s16, %s21_s16 }
   0xc   :  { %p309_p3 = scmp.ne.s32.totalorder %s21_s16, %s308_s26  ;;  %p314_p5 = scmp.lt.s32.totalorder %s308_s26, %s308_s26 }
   0xe   :  { %p315_p6 = por %p314_p5, %p313_p4 }
  0x10   :  { %p316_p7 = pnand %p315_p6, %p309_p3 }
  0x12   :  { %319 = shalt.err (!%p316_p7)
}
  0x13   :  { %23 = dma.hbm_to_vmem [thread:$0]  %s484_s0, 32, %s21_s16, [#allocation3]  }
  0x14   :  { %s320_s5 = scalar_lea.hbm %s485_s1, 256 }
  0x15   :  { %p321_p8 = scmp.ne.s32.totalorder %s485_s1, %s320_s5  ;;  %p324_p9 = scmp.lt.u32.totalorder %s320_s5, %s485_s1 }
  0x17   :  { %p326_p10 = pnand %p324_p9, %p321_p8 }
  0x19   :  { %329 = shalt.err (!%p326_p10)
}
  0x1a   :  { %s330_s10 = scalar_lea.vmem %s31_s18, 256  ;;  %p335_p12 = scmp.lt.s32.totalorder %s31_s18, %s31_s18 }
  0x1b   :  { %p331_p11 = scmp.ne.s32.totalorder %s31_s18, %s330_s10  ;;  %p336_p13 = scmp.lt.s32.totalorder %s330_s10, %s330_s10 }
  0x1d   :  { %p337_p0 = por %p336_p13, %p335_p12 }
  0x1f   :  { %p338_p1 = pnand %p337_p0, %p331_p11 }
  0x21   :  { %341 = shalt.err (!%p338_p1)
}
  0x22   :  { %33 = dma.hbm_to_vmem [thread:$0]  %s485_s1, 256, %s31_s18, [#allocation6]  }
  0x23   :  { %386 = dma.done.wait [#allocation3], 32  }
  0x24   :  { %387 = vsyncadd [#allocation3], 4294967264 }
  0x25   :  { %388 = dma.done.wait [#allocation6], 256  }
  0x26   :  { %389 = vsyncadd [#allocation6], 4294967040  ;;  %v396_v0 = vmov 0.0   ;;  %vm196_vm0 = vcmask 57344   ;;  %v94_v1 = vld [vmem:[#allocation5 + $0x8] sm:$0xff]  ;;  %v93_v2 = vld [vmem:[#allocation5] sm:$0xff]  ;;  %v52_v14 = vlaneseq }
  0x27   :  { %163 = vmatprep.mubr.f32.mxu0 %v396_v0  ;;  %v92_v3 = vld [vmem:[%s486_s2] sm:$0x1]  ;;  %vm95_vm1 = vcmask 64512   ;;  %99 = vmatprep.subr.mxu0 %v94_v1  ;;  %vm76_vm2 = vcmask 1040384   ;;  %s397_s1 = smov [#allocation7]  }
  0x28   :  { %v197_v4 = vsel %vm196_vm0, %v92_v3, 0.0  ;;  %v42_v5 = vld [vmem:[#allocation2] sm:$0x3]  ;;  %100 = vmatpush1.msra.mxu0 %v93_v2  ;;  %v67_v17 = vshrl.u32 %v52_v14, 7  ;;  %vm54_vm3 = vcmp.lt.s32.totalorder %v52_v14, 256  ;;  %s250_s2 = sshll.u32 %s397_s1, 4  ;;  %s251_s2 = int_to_ptr.vmem [resolvable:$true] %s250_s2 }
  0x29   :  { %198 = vadd.xlane.f32.xlu1 %v197_v4  ;;  %v274_v6 = vmul.f32 -1.442695, %v42_v5  ;;  %276 = vmatmul.mubr.msk.f32.vlgmr.msra.gmra.mrb[0].mxu0 %vm95_vm1, %v92_v3  ;;  %s342_s14 = scalar_lea.vmem %s251_s2, 32  ;;  %p347_p3 = scmp.lt.s32.totalorder %s251_s2, %s251_s2 }
  0x2a   :  { %v68_v22 = vsub.s32 0, %v67_v17  ;;  %v72_v23 = vsub.s32 1, %v67_v17  ;;  %p343_p2 = scmp.ne.s32.totalorder %s251_s2, %s342_s14  ;;  %p348_p4 = scmp.lt.s32.totalorder %s342_s14, %s342_s14 }
  0x2b   :  { %290 = vpow2.f32 %v274_v6 }
  0x2c   :  { %p349_p5 = por %p348_p4, %p347_p3 }
  0x2e   :  { %p350_p6 = pnand %p349_p5, %p343_p2 }
  0x35   :  { %v291_v7 = vpop.eup %290 }
  0x36   :  { %v46_v8 = vadd.f32 1.0, %v291_v7 }
  0x38   :  { %292 = vrcp.f32 %v46_v8 }
  0x42   :  { %v293_v9 = vpop.eup %292 }
  0x43   :  { %v275_v10 = vadd.f32 -0.5, %v293_v9 }
  0x45   :  { %v50_v11 = vmul.f32 0.6, %v275_v10 }
  0x47   :  { %v51_v12 = vadd.f32 0.5, %v50_v11 }
  0x49   :  { %294 = vlog2.f32 %v51_v12  ;;  %v59_v13 = vsub.f32 1.0, %v51_v12  ;;  %56 = vst.msk [vmem:[#allocation7] sm:$0x3] %vm54_vm3, %v51_v12 }
  0x4b   :  { %296 = vlog2.f32 %v59_v13 }
  0x53   :  { %v295_v15 = vpop.eup %294 }
  0x54   :  { %v58_v16 = vmul.f32 0.6931472, %v295_v15 }
  0x55   :  { %v297_v18 = vpop.eup %296 }
  0x56   :  { %v61_v19 = vmul.f32 0.6931472, %v297_v18  ;;  %v62_v20 = vmul.f32 %v58_v16, %v51_v12 }
  0x58   :  { %v63_v21 = vmul.f32 %v61_v19, %v59_v13  ;;  %v211_v30 = vrot.slane %v61_v19, %v68_v22  ;;  %v215_v31 = vrot.slane %v61_v19, %v72_v23  ;;  %v170_v32 = vsub.f32 %v58_v16, %v61_v19 }
  0x5a   :  { %v64_v24 = vadd.f32 %v63_v21, %v62_v20  ;;  %v218_v33 = vsel %vm76_vm2, %v211_v30, 0.0  ;;  %v219_v34 = vsel %vm76_vm2, %v215_v31, 0.0  ;;  %v175_v35 = vrot.slane %v170_v32, %v68_v22 }
  0x5b   :  { %v220_v36 = vadd.f32 %v219_v34, %v218_v33  ;;  %v179_v37 = vrot.slane %v170_v32, %v72_v23 }
  0x5c   :  { %v69_v25 = vrot.slane %v64_v24, %v68_v22  ;;  %v73_v26 = vrot.slane %v64_v24, %v72_v23 }
  0x5d   :  { %221 = vadd.xlane.f32.xlu1 %v220_v36 }
  0x5e   :  { %v77_v27 = vsel %vm76_vm2, %v69_v25, 0.0  ;;  %v78_v28 = vsel %vm76_vm2, %v73_v26, 0.0 }
  0x5f   :  { %v79_v29 = vadd.f32 %v78_v28, %v77_v27 }
  0x61   :  { %80 = vadd.xlane.f32.xlu0 %v79_v29 }
  0xee   :  { %v81_v42 = vpop.xlane.xlu0 %80 }
  0xef   :  { %v82_v46 = vrot.slane %v81_v42, 4 }
  0xf1   :  { %v83_v47 = vadd.f32 %v82_v46, %v81_v42 }
  0xf3   :  { %v84_v48 = vrot.slane %v83_v47, 2 }
  0xf5   :  { %v85_v49 = vadd.f32 %v84_v48, %v83_v47 }
  0xf7   :  { %v86_v50 = vrot.slane %v85_v49, 1 }
  0xf9   :  { %v87_v51 = vadd.f32 %v86_v50, %v85_v49 }
  0xfb   :  { %277 = vpush %v87_v51 }
  0xfc   :  { %v165_v38 = vpop.f32.mrb[0].mxu0 }
  0xfd   :  { %v182_v39 = vmul.f32 %v175_v35, %v165_v38  ;;  %v167_v40 = vpop.f32.mrb[1].mxu0 }
  0xfe   :  { %v183_v41 = vmul.f32 %v179_v37, %v167_v40 }
  0xff   :  { %v184_v43 = vsel %vm76_vm2, %v182_v39, 0.0 }
 0x100   :  { %v185_v44 = vsel %vm76_vm2, %v183_v41, 0.0 }
 0x101   :  { %v186_v45 = vadd.f32 %v185_v44, %v184_v43 }
 0x103   :  { %187 = vadd.xlane.f32.xlu0 %v186_v45 }
 0x104   :  { %353 = shalt.err (!%p350_p6)
}
 0x105   :  { %s354_s17 = scalar_lea.hbm %s487_s3, 32 }
 0x106   :  { %p355_p7 = scmp.ne.s32.totalorder %s487_s3, %s354_s17  ;;  %p358_p8 = scmp.lt.u32.totalorder %s354_s17, %s487_s3 }
 0x108   :  { %p360_p9 = pnand %p358_p8, %p355_p7 }
 0x10a   :  { %363 = shalt.err (!%p360_p9)
}
 0x10b   :  { %253 = dma.vmem_to_hbm [thread:$0]  %s251_s2, 32, %s487_s3, [#allocation4]   ;;  %v199_v52 = vpop.xlane.xlu1 %198  ;;  %v236_v9 = vand.u32 127, %v52_v14 }
 0x10c   :  { %v200_v54 = vrot.slane %v199_v52, 4  ;;  %s398_s7 = smov [#allocation8]  }
 0x10d   :  { %vm238_vm4 = vcmp.eq.s32.totalorder %v236_v9, 1  ;;  %s260_s8 = sshll.u32 %s398_s7, 4  ;;  %vm237_vm5 = vcmp.eq.s32.totalorder %v236_v9, 0  ;;  %s261_s8 = int_to_ptr.vmem [resolvable:$true] %s260_s8 }
 0x10e   :  { %v201_v56 = vadd.f32 %v200_v54, %v199_v52  ;;  %s364_s9 = scalar_lea.vmem %s261_s8, 16  ;;  %s368_s10 = scalar_lea.vmem %s261_s8, 32 }
 0x10f   :  { %v222_v53 = vpop.xlane.xlu1 %221  ;;  %p365_p10 = scmp.ne.s32.totalorder %s261_s8, %s364_s9  ;;  %p369_p11 = scmp.lt.s32.totalorder %s261_s8, %s261_s8 }
 0x110   :  { %v223_v55 = vrot.slane %v222_v53, 4  ;;  %v202_v58 = vrot.slane %v201_v56, 2  ;;  %p370_p12 = scmp.lt.s32.totalorder %s368_s10, %s364_s9 }
 0x112   :  { %v224_v57 = vadd.f32 %v223_v55, %v222_v53  ;;  %v203_v63 = vadd.f32 %v202_v58, %v201_v56  ;;  %p371_p13 = por %p370_p12, %p369_p11 }
 0x114   :  { %v225_v60 = vrot.slane %v224_v57, 2  ;;  %v204_v3 = vrot.slane %v203_v63, 1  ;;  %p372_p0 = pnand %p371_p13, %p365_p10 }
 0x116   :  { %v226_v0 = vadd.f32 %v225_v60, %v224_v57  ;;  %v205_v7 = vadd.f32 %v204_v3, %v203_v63 }
 0x118   :  { %v227_v5 = vrot.slane %v226_v0, 1 }
 0x11a   :  { %v228_v8 = vadd.f32 %v227_v5, %v226_v0 }
 0x12c   :  { %s278_s3 = spop %277 }
 0x12d   :  { %s91_s26 = smul.f32 0.00390625, %s278_s3 }
 0x12f   :  { %s233_s30 = smul.f32 0.1, %s91_s26  ;;  %v241_v11 = vstv %s91_s26 }
 0x190   :  { %v188_v59 = vpop.xlane.xlu0 %187 }
 0x191   :  { %v189_v61 = vrot.slane %v188_v59, 4 }
 0x193   :  { %v190_v62 = vadd.f32 %v189_v61, %v188_v59 }
 0x195   :  { %v191_v1 = vrot.slane %v190_v62, 2 }
 0x197   :  { %v192_v2 = vadd.f32 %v191_v1, %v190_v62 }
 0x199   :  { %v193_v4 = vrot.slane %v192_v2, 1 }
 0x19b   :  { %v194_v6 = vadd.f32 %v193_v4, %v192_v2 }
 0x19d   :  { %279 = vpush %v194_v6 }
 0x19e   :  { %281 = vpush %v205_v7 }
 0x19f   :  { %283 = vpush %v228_v8 }
 0x1ce   :  { %s280_s24 = spop %279 }
 0x1cf   :  { %s282_s25 = spop %281 }
 0x1d0   :  { %s284_s27 = spop %283 }
 0x1d1   :  { %s230_s28 = smul.f32 %s284_s27, %s282_s25 }
 0x1d3   :  { %s231_s29 = sadd.f32 %s280_s24, %s230_s28 }
 0x1d5   :  { %s232_s5 = smul.f32 0.125, %s231_s29 }
 0x1d7   :  { %s234_s6 = sadd.f32 %s233_s30, %s232_s5 }
 0x1d9   :  { %v239_v10 = vstv %s234_s6 }
 0x1da   :  { %v240_v12 = vsel %vm238_vm4, %v239_v10, 0.0 }
 0x1db   :  { %v242_v13 = vsel %vm237_vm5, %v241_v11, %v240_v12 }
 0x1dc   :  { %243 = vst [vmem:[#allocation8] sm:$0x1] %v242_v13 }
 0x1dd   :  { %375 = shalt.err (!%p372_p0)
}
 0x1de   :  { %s376_s12 = scalar_lea.hbm %s488_s4, 16 }
 0x1df   :  { %p377_p1 = scmp.ne.s32.totalorder %s488_s4, %s376_s12  ;;  %p380_p2 = scmp.lt.u32.totalorder %s376_s12, %s488_s4 }
 0x1e1   :  { %p382_p3 = pnand %p380_p2, %p377_p1 }
 0x1e3   :  { %385 = shalt.err (!%p382_p3)
}
 0x1e4   :  { %263 = dma.vmem_to_hbm [thread:$0]  %s261_s8, 16, %s488_s4, [#allocation9]  }
 0x1e5   :  { %390 = dma.done.wait [#allocation4], 32  }
 0x1e6   :  { %391 = vsyncadd [#allocation4], 4294967264 }
 0x1e7   :  { %392 = dma.done.wait [#allocation9], 16  }
 0x1e8   :  { %393 = vsyncadd [#allocation9], 4294967280 }
 0x1e9   :  { %270 = vsyncpa [#allocation3], 1 }
 0x1ea   :  { %271 = vsyncpa [#allocation6], 1 }
 0x1eb   :  { %272 = vsyncpa [#allocation4], 1 }
 0x1ec   :  { %273 = vsyncpa [#allocation9], 1 }

</bundles_post_ra>
